<compile_context>
chip_gen: v5e
topology: v5e:2x2
jax: 0.10.0
libtpu: 0.0.40
codegen_flags: <defaults>
</compile_context>

<pallas_src>
import jax
import jax.numpy as jnp
from jax.experimental import pallas as pl
from jax.experimental.pallas import tpu as pltpu

IN_DIM = 70          # forced by head.view(in_dim, 1) / h_conv.view(70, 1)
HIDDEN_DIM = 32
MEM_DIM = 16         # unused in forward
NUM_CLASSES = 4      # wp always outputs 4

LANE = 128                     # f32 lane tile
K_PAD = 6 * LANE               # 6 chunk-aligned feature blocks -> 768
H_PAD = 128                    # padded hidden width  (>= 32 + 1 bias col)
N_PAD = 128                    # padded output width  (>= 4)
BIAS_SAT = 50.0                # sigmoid(50) == 1.0 exactly in f32


def _round_up(x, m):
    return (x + m - 1) // m * m


def similarity_kernel(x_ref, wh_ref, wp_ref, out_ref):
    # x_ref block: (3, b_tile, 128) = stacked [head, low, high], lanes 70:128 zero.
    head = x_ref[0]
    low = x_ref[1]
    high = x_ref[2]

    d_low = jnp.abs(low - head)
    d_high = jnp.abs(high - head)

    # Force the bias lane (lane IN_DIM of chunk 0) to 1.0 so the augmented
    # wh row IN_DIM injects wh_b and saturates hidden column 32 (-> wp bias).
    lane = jax.lax.broadcasted_iota(jnp.int32, d_low.shape, dimension=1)
    d_low = jnp.where(lane == IN_DIM, 1.0, d_low)

    # (b_tile, 768) feature row; every chunk is 128-lane aligned.
    feature = jnp.concatenate(
        [d_low, d_high, low * head, high * head, low, high], axis=1)

    h = jax.nn.sigmoid(
        jnp.dot(feature, wh_ref[...], preferred_element_type=jnp.float32))
    # Padded hidden cols 33:128 are sigmoid(0)=0.5 but wp rows 33:128 are zero;
    # col 32 is exactly 1.0 and picks up wp_b from wp row 32.
    out_ref[...] = jnp.dot(h, wp_ref[...], preferred_element_type=jnp.float32)


def init_params(key, in_dim=IN_DIM, hidden_dim=HIDDEN_DIM):
    """PyTorch nn.Linear default init: U(-k, k), k = 1/sqrt(fan_in)."""
    k1, k2, k3, k4 = jax.random.split(key, 4)
    kwh = 1.0 / jnp.sqrt(6.0 * in_dim)
    kwp = 1.0 / jnp.sqrt(float(hidden_dim))
    wh_w = jax.random.uniform(k1, (hidden_dim, 6 * in_dim), jnp.float32, -kwh, kwh)
    wh_b = jax.random.uniform(k2, (hidden_dim,), jnp.float32, -kwh, kwh)
    wp_w = jax.random.uniform(k3, (4, hidden_dim), jnp.float32, -kwp, kwp)
    wp_b = jax.random.uniform(k4, (4,), jnp.float32, -kwp, kwp)
    return wh_w, wh_b, wp_w, wp_b


def pack_params(params):
    """One-time packing of weights into the augmented kernel layout."""
    wh_w, wh_b, wp_w, wp_b = params
    # (420, 32) math-layout weights, split into 6 chunks of 70 rows and padded
    # to 6 x (128, 128) so each chunk lines up with a 128-lane feature block.
    whT = wh_w.T.astype(jnp.float32).reshape(6, IN_DIM, HIDDEN_DIM)
    whT = jnp.pad(whT, ((0, 0), (0, LANE - IN_DIM), (0, H_PAD - HIDDEN_DIM)))
    wh_aug = whT.reshape(K_PAD, H_PAD)
    # Augmented bias row: multiplied by the in-kernel 1.0 at feature lane 70.
    wh_aug = wh_aug.at[IN_DIM, :HIDDEN_DIM].set(wh_b.astype(jnp.float32))
    wh_aug = wh_aug.at[IN_DIM, HIDDEN_DIM].set(jnp.float32(BIAS_SAT))

    wp_aug = jnp.zeros((H_PAD, N_PAD), jnp.float32)
    wp_aug = wp_aug.at[:HIDDEN_DIM, :NUM_CLASSES].set(wp_w.T.astype(jnp.float32))
    wp_aug = wp_aug.at[HIDDEN_DIM, :NUM_CLASSES].set(wp_b.astype(jnp.float32))
    return wh_aug, wp_aug


def similarity_forward(h_conv, l_conv, head, low, high, packed_params, *, b_tile=128):
    del h_conv, l_conv  # dead code in the reference forward (head_conv unused)
    wh_aug, wp_aug = packed_params

    head = head.reshape(-1, IN_DIM)
    low = low.reshape(-1, IN_DIM)
    high = high.reshape(-1, IN_DIM)
    B = head.shape[0]

    b_tile = _round_up(max(8, min(int(b_tile), _round_up(B, 8))), 8)
    B_pad = _round_up(B, b_tile)
    grid = (B_pad // b_tile,)

    # Minimal per-call packing: stack + cast + pad (3 XLA ops) -> one operand.
    x = jnp.stack([head, low, high], axis=0).astype(jnp.float32)      # (3, B, 70)
    x = jnp.pad(x, ((0, 0), (0, B_pad - B), (0, LANE - IN_DIM)))       # (3, B_pad, 128)

    cost = pl.CostEstimate(
        flops=2 * B_pad * (K_PAD * H_PAD + H_PAD * N_PAD),
        transcendentals=B_pad * H_PAD,
        bytes_accessed=4 * (3 * B_pad * LANE + K_PAD * H_PAD
                            + H_PAD * N_PAD + B_pad * N_PAD),
    )

    out = pl.pallas_call(
        similarity_kernel,
        out_shape=jax.ShapeDtypeStruct((B_pad, N_PAD), jnp.float32),
        grid=grid,
        in_specs=[
            pl.BlockSpec((3, b_tile, LANE), lambda b: (0, b, 0)),   # batch tile
            pl.BlockSpec((K_PAD, H_PAD), lambda b: (0, 0)),         # grid-resident
            pl.BlockSpec((H_PAD, N_PAD), lambda b: (0, 0)),         # grid-resident
        ],
        out_specs=pl.BlockSpec((b_tile, N_PAD), lambda b: (b, 0)),
        compiler_params=pltpu.CompilerParams(dimension_semantics=("parallel",)),
        cost_estimate=cost,
    )(x, wh_aug, wp_aug)

    return out[:B, :NUM_CLASSES]   # (B, 4); (1, 4) for the single-example case


def similarity_reference(head, low, high, params):
    """Pure-JAX reference of the PyTorch forward (correctness check)."""
    wh_w, wh_b, wp_w, wp_b = params
    head = head.reshape(-1, IN_DIM)
    low = low.reshape(-1, IN_DIM)
    high = high.reshape(-1, IN_DIM)
    feat = jnp.concatenate([jnp.abs(low - head), jnp.abs(high - head),
                            low * head, high * head, low, high], axis=1)  # (B, 420)
    h = jax.nn.sigmoid(feat @ wh_w.T + wh_b)
    return h @ wp_w.T + wp_b


if __name__ == "__main__":
    key = jax.random.PRNGKey(0)
    kp, k1, k2, k3, k4, k5 = jax.random.split(key, 6)

    params = init_params(kp)
    packed = pack_params(params)          # one-time weight packing (not per call)

    B = 16                                 # small batch; grid of 2 tiles of 8
    h_conv = jax.random.normal(k1, (B, 70), jnp.float32)
    l_conv = jax.random.normal(k2, (B, 70), jnp.float32)
    head = jax.random.normal(k3, (B, IN_DIM), jnp.float32)
    low = jax.random.normal(k4, (B, IN_DIM), jnp.float32)
    high = jax.random.normal(k5, (B, IN_DIM), jnp.float32)

    forward = jax.jit(similarity_forward, static_argnames=("b_tile",))

    out = forward(h_conv, l_conv, head, low, high, packed, b_tile=8)
    out = jax.block_until_ready(out)
    ref = similarity_reference(head, low, high, params)
    assert out.shape == (B, NUM_CLASSES), out.shape
    assert jnp.allclose(out, ref, atol=1e-5, rtol=1e-5), (out, ref)

    # Original single-example interface still works and returns (1, 4).
    out1 = jax.block_until_ready(
        forward(h_conv[0], l_conv[0], head[0], low[0], high[0], packed, b_tile=8))
    ref1 = similarity_reference(head[0], low[0], high[0], params)
    assert out1.shape == (1, NUM_CLASSES), out1.shape
    assert jnp.allclose(out1, ref1, atol=1e-5, rtol=1e-5), (out1, ref1)

    print("KERNEL_OK")
</pallas_src>

<mosaic_0001>
module attributes {stable_mosaic.version = 11 : i64} {
  func.func @similarity_kernel(%arg0: i32, %arg1: memref<3x8x128xf32, #tpu.memory_space<vmem>>, %arg2: memref<768x128xf32, #tpu.memory_space<vmem>>, %arg3: memref<128x128xf32, #tpu.memory_space<vmem>>, %arg4: memref<8x128xf32, #tpu.memory_space<vmem>>) attributes {dimension_semantics = [#tpu.dimension_semantics<parallel>], iteration_bounds = array<i64: 2>, scalar_prefetch = 0 : i64, scratch_operands = 0 : i64, tpu.core_type = #tpu.core_type<tc>, window_params = [{transform_indices = @transform_0, window_bounds = array<i64: 3, 8, 128>}, {pipeline_mode = #tpu.pipeline_mode<synchronous>, transform_indices = @transform_1, window_bounds = array<i64: 768, 128>}, {pipeline_mode = #tpu.pipeline_mode<synchronous>, transform_indices = @transform_2, window_bounds = array<i64: 128, 128>}, {transform_indices = @transform_3, window_bounds = array<i64: 8, 128>}]} {
    %c0 = arith.constant 0 : index
    %c0_0 = arith.constant 0 : index
    %c0_1 = arith.constant 0 : index
    %0 = vector.load %arg1[%c0, %c0_0, %c0_1] : memref<3x8x128xf32, #tpu.memory_space<vmem>>, vector<1x8x128xf32>
    %1 = vector.shape_cast %0 : vector<1x8x128xf32> to vector<8x128xf32>
    %c1 = arith.constant 1 : index
    %c0_2 = arith.constant 0 : index
    %c0_3 = arith.constant 0 : index
    %2 = vector.load %arg1[%c1, %c0_2, %c0_3] : memref<3x8x128xf32, #tpu.memory_space<vmem>>, vector<1x8x128xf32>
    %3 = vector.shape_cast %2 : vector<1x8x128xf32> to vector<8x128xf32>
    %c2 = arith.constant 2 : index
    %c0_4 = arith.constant 0 : index
    %c0_5 = arith.constant 0 : index
    %4 = vector.load %arg1[%c2, %c0_4, %c0_5] : memref<3x8x128xf32, #tpu.memory_space<vmem>>, vector<1x8x128xf32>
    %5 = vector.shape_cast %4 : vector<1x8x128xf32> to vector<8x128xf32>
    %6 = arith.subf %3, %1 : vector<8x128xf32>
    %7 = math.absf %6 : vector<8x128xf32>
    %8 = arith.subf %5, %1 : vector<8x128xf32>
    %9 = math.absf %8 : vector<8x128xf32>
    %10 = tpu.iota {dimensions = array<i32: 1>} : vector<8x128xi32>
    %c70_i32 = arith.constant 70 : i32
    %11 = vector.broadcast %c70_i32 : i32 to vector<8x128xi32>
    %12 = arith.cmpi eq, %10, %11 : vector<8x128xi32>
    %cst = arith.constant 1.000000e+00 : f32
    %13 = vector.broadcast %cst : f32 to vector<8x128xf32>
    %14 = arith.select %12, %13, %7 : vector<8x128xi1>, vector<8x128xf32>
    %15 = arith.mulf %3, %1 : vector<8x128xf32>
    %16 = arith.mulf %5, %1 : vector<8x128xf32>
    %17 = tpu.concatenate %14, %9, %15, %16, %3, %5 in 1 : vector<8x128xf32>, vector<8x128xf32>, vector<8x128xf32>, vector<8x128xf32>, vector<8x128xf32>, vector<8x128xf32> -> vector<8x768xf32>
    %c0_6 = arith.constant 0 : index
    %c0_7 = arith.constant 0 : index
    %18 = vector.load %arg2[%c0_6, %c0_7] : memref<768x128xf32, #tpu.memory_space<vmem>>, vector<768x128xf32>
    %cst_8 = arith.constant dense<0.000000e+00> : vector<8x128xf32>
    %19 = tpu.matmul %17, %18, %cst_8 {dimension_numbers = #tpu.dot_dimension_numbers<[1], [0], [0], [1], [0, 0, 1, 1], [], []>} : vector<8x768xf32>, vector<768x128xf32>, vector<8x128xf32> -> vector<8x128xf32>
    %20 = arith.negf %19 : vector<8x128xf32>
    %21 = math.exp %20 : vector<8x128xf32>
    %cst_9 = arith.constant 1.000000e+00 : f32
    %22 = vector.broadcast %cst_9 : f32 to vector<8x128xf32>
    %23 = arith.addf %22, %21 : vector<8x128xf32>
    %24 = arith.divf %22, %23 : vector<8x128xf32>
    %c0_10 = arith.constant 0 : index
    %c0_11 = arith.constant 0 : index
    %25 = vector.load %arg3[%c0_10, %c0_11] : memref<128x128xf32, #tpu.memory_space<vmem>>, vector<128x128xf32>
    %cst_12 = arith.constant dense<0.000000e+00> : vector<8x128xf32>
    %26 = tpu.matmul %24, %25, %cst_12 {dimension_numbers = #tpu.dot_dimension_numbers<[1], [0], [0], [1], [0, 0, 1, 1], [], []>} : vector<8x128xf32>, vector<128x128xf32>, vector<8x128xf32> -> vector<8x128xf32>
    %c0_13 = arith.constant 0 : index
    %c0_14 = arith.constant 0 : index
    %27 = vector.load %arg4[%c0_13, %c0_14] : memref<8x128xf32, #tpu.memory_space<vmem>>, vector<8x128xf32>
    tpu.vector_store %arg4[%c0_13, %c0_14], %26 {strides = array<i32>} : memref<8x128xf32, #tpu.memory_space<vmem>>, vector<8x128xf32>,
    return
  }
  func.func @transform_0(%arg0: i32) -> (i32, i32, i32) {
    %c0_i32 = arith.constant 0 : i32
    %c0_i32_0 = arith.constant 0 : i32
    %c0_i32_1 = arith.constant 0 : i32
    return %c0_i32, %arg0, %c0_i32_0 : i32, i32, i32
  }
  func.func @transform_1(%arg0: i32) -> (i32, i32) {
    %c0_i32 = arith.constant 0 : i32
    %c0_i32_0 = arith.constant 0 : i32
    %c0_i32_1 = arith.constant 0 : i32
    return %c0_i32, %c0_i32_0 : i32, i32
  }
  func.func @transform_2(%arg0: i32) -> (i32, i32) {
    %c0_i32 = arith.constant 0 : i32
    %c0_i32_0 = arith.constant 0 : i32
    %c0_i32_1 = arith.constant 0 : i32
    return %c0_i32, %c0_i32_0 : i32, i32
  }
  func.func @transform_3(%arg0: i32) -> (i32, i32) {
    %c0_i32 = arith.constant 0 : i32
    %c0_i32_0 = arith.constant 0 : i32
    return %arg0, %c0_i32 : i32, i32
  }
}

</mosaic_0001>

<bundles_post_ra>
// kernel: similarity_forward.1
= control target key start
LH: loop header
LB: loop body
LE: loop exit
PB: predicated region body
PF: predicated region fallthrough
CT: control target
= control target key end

     0   :  { %8 = vsyncpa [#allocation4], 0  ;;  %s899_s0 = inlined_call_operand.vmem [shape: f32[3,16,128], index: 0, kind: input, shape index: {}]   ;;  %s900_s1 = inlined_call_operand.hbm [shape: f32[768,128], index: 1, kind: input, shape index: {}]   ;;  %s901_s2 = inlined_call_operand.hbm [shape: f32[128,128], index: 2, kind: input, shape index: {}]   ;;  %s902_s3 = inlined_call_operand.vmem [shape: f32[16,128], index: 3, kind: output, shape index: {}]  }
   0x1   :  { %9 = vsyncpa [#allocation6], 0  ;;  %s799_s12 = smov 0   ;;  %s801_s13 = smov 0  }
   0x2   :  { %s803_s14 = smov 0  }
   0x3 LB: > { %s815_s15 = sadd.s32 4294967295, %s773_s14   ;;  %s818_s16 = sadd.s32 1, %s773_s14   ;;  %s773_s14 = sphi %s803_s14, %s907_s14   ;;  %s769_s13 = sphi %s801_s13, %s906_s13   ;;  %s765_s12 = sphi %s799_s12, %s905_s12  }
   0x4   : > { %s19_s17 = ssub.s32 %s773_s14, %s818_s16  ;;  %s22_s18 = sadd.s32 1, %s769_s13 }
   0x5   : > { %p20_p0 = scmp.eq.s32.totalorder %s19_s17, 0  ;;  %p29_p1 = scmp.ne.s32.totalorder %s769_s13, %s765_s12 }
   0x6   : > { %p30_p2 = scmp.eq.s32.totalorder %s773_s14, 0  ;;  %p616_p3 = scmp.ge.s32.totalorder %s773_s14, 1 }
   0x7   : > { %s828_s19 = scalar_select %p20_p0, %s769_s13, %s22_s18  }
   0x8   : > { %p830_p4 = por %p30_p2, %p29_p1  ;;  %p114_p5 = scmp.lt.s32.totalorder %s773_s14, 3 }
   0x9   : > { %p647_p6 = scmp.eq.s32.totalorder %s815_s15, 0  ;;  %s125_s24 = sshll.u32 %s900_s1, 4  ;;  %s126_s24 = int_to_ptr.hbm [resolvable:$true] %s125_s24 }
   0xa   : > { %p836_p7 = pnand %p616_p3, %p114_p5  ;;  %s775_s25 = smov [#allocation3]  }
   0xb   : > { %s127_s26 = sshll.u32 %s775_s25, 4  ;;  %s139_s29 = sshll.u32 %s901_s2, 4  ;;  %s128_s26 = int_to_ptr.vmem [resolvable:$true] %s127_s26  ;;  %s140_s29 = int_to_ptr.hbm [resolvable:$true] %s139_s29 }
   0xc   : > { %p640_p8 = pneg %p836_p7  ;;  %s776_s30 = smov 128  }
   0xd   : > { %s777_s4 = smov 8   ;;  %s778_s5 = smov [#allocation5]  }
   0xe   : > { %p641_p9 = pnand %p647_p6, %p640_p8  ;;  %s141_s6 = sshll.u32 %s778_s5, 4  ;;  %s142_s6 = int_to_ptr.vmem [resolvable:$true] %s141_s6 }
   0xf   : > { %p619_p10 = scmp.ge.s32.totalorder %s773_s14, 2 }
  0x10   : > { %643 = dma.hbm_to_vmem [thread:$0]  (!%p641_p9), %s126_s24, 12288, %s128_s26, [#allocation4], %s776_s30, %s776_s30, %s777_s4  }
  0x11   : > { %646 = dma.hbm_to_vmem [thread:$0]  (!%p641_p9), %s140_s29, 2048, %s142_s6, [#allocation6], %s776_s30, %s776_s30, %s777_s4  }
  0x12   : > { %151 = sbr.rel (%p619_p10) target bundleno = 30 (0x1e), region = 24 }
  0x17   : > { %154 = sbr.rel (!%p830_p4) target bundleno = 30 (0x1e), region = 28  ;;  %s156_s7 = sand.u32 (%p830_p4), 1, %s769_s13  }
  0x18   : > { %s620_s8 = sshll.u32 (%p830_p4), %s773_s14, 3  ;;  %s630_s9 = smul.u32 (%p830_p4), 24, %s156_s7 }
  0x19   : > { %s160_s17 = scalar_lea.vmem (%p830_p4), %s899_s0, %s620_s8 }
  0x1a   : > { %v193_v0 = vld [vmem:[%s160_s17] sm:$0xff] (%p830_p4)  ;;  %v195_v1 = vld [vmem:[%s160_s17 + $0x10] sm:$0xff] (%p830_p4)  ;;  %s158_s18 = scalar_lea.vmem (%p830_p4), [#allocation2], %s630_s9 }
  0x1b   : > { %v197_v2 = vld [vmem:[%s160_s17 + $0x20] sm:$0xff] (%p830_p4)  ;;  %194 = vst [vmem:[%s158_s18] sm:$0xff] (%p830_p4), %v193_v0 }
  0x1c   : > { %196 = vst [vmem:[%s158_s18 + $0x8] sm:$0xff] %v195_v1 }
  0x1d   : > { %198 = vst [vmem:[%s158_s18 + $0x10] sm:$0xff] %v197_v2 }
  0x1e PF: > { %207 = sbr.rel (%p836_p7) target bundleno = 393 (0x189), region = 66  ;;  %s210_s14 = sand.u32 (!%p836_p7), 1, %s765_s12  }
  0x1f   : > { %s631_s20 = smul.u32 (!%p836_p7), 24, %s210_s14 }
  0x21   : > { %s861_s22 = scalar_lea.vmem (!%p836_p7), [#allocation2], %s631_s20 }
  0x23   : > { %756 = dma.done.wait (%p647_p6), [#allocation4], 12288  }
  0x24   : > { %758 = vsyncadd (%p647_p6), [#allocation4], 4294955008 }
  0x25   : > { %760 = dma.done.wait (%p647_p6), [#allocation6], 2048  }
  0x26   : > { %762 = vsyncadd (%p647_p6), [#allocation6], 4294965248  ;;  %v276_v3 = vld [vmem:[#allocation3 + $0x78] sm:$0xff]  ;;  %v275_v4 = vld [vmem:[#allocation3 + $0x70] sm:$0xff]  ;;  %v255_v63 = vlaneseq  ;;  %p242_p11 = scmp.lt.s32.totalorder %s815_s15, 1 }
  0x27   : > { %v292_v5 = vld [vmem:[#allocation3 + $0xf8] sm:$0xff]  ;;  %357 = vmatpush.msra.mxu0 %v276_v3  ;;  %v291_v6 = vld [vmem:[#allocation3 + $0xf0] sm:$0xff]  ;;  %v274_v7 = vld [vmem:[#allocation3 + $0x68] sm:$0xff] }
  0x28   : > { %377 = vmatpush.msra.mxu1 %v292_v5  ;;  %v290_v8 = vld [vmem:[#allocation3 + $0xe8] sm:$0xff]  ;;  %v273_v9 = vld [vmem:[#allocation3 + $0x60] sm:$0xff]  ;;  %v272_v11 = vld [vmem:[#allocation3 + $0x58] sm:$0xff]  ;;  %s909_s15 = smov (!%p242_p11, %s815_s15), 1 }
  0x29   : > { %358 = vmatpush.msra.mxu0 %v275_v4  ;;  %v289_v10 = vld [vmem:[#allocation3 + $0xe0] sm:$0xff]  ;;  %v288_v12 = vld [vmem:[#allocation3 + $0xd8] sm:$0xff]  ;;  %v307_v14 = vld [vmem:[#allocation3 + $0x170] sm:$0xff]  ;;  %s624_s12 = sshll.u32 %s909_s15, 3 }
  0x2a   : > { %378 = vmatpush.msra.mxu1 %v291_v6  ;;  %v308_v13 = vld [vmem:[#allocation3 + $0x178] sm:$0xff]  ;;  %v271_v16 = vld [vmem:[#allocation3 + $0x50] sm:$0xff]  ;;  %v306_v18 = vld [vmem:[#allocation3 + $0x168] sm:$0xff]  ;;  %s245_s24 = scalar_lea.vmem %s902_s3, %s624_s12 }
  0x2b   : > { %359 = vmatpush.msra.mxu0 %v274_v7  ;;  %v324_v15 = vld [vmem:[#allocation3 + $0x1f8] sm:$0xff]  ;;  %v287_v17 = vld [vmem:[#allocation3 + $0xd0] sm:$0xff]  ;;  %397 = vmatpush.msra.mxu2 %v308_v13  ;;  %v270_v20 = vld [vmem:[#allocation3 + $0x48] sm:$0xff] }
  0x2c   : > { %379 = vmatpush.msra.mxu1 %v290_v8  ;;  %417 = vmatpush.msra.mxu3 %v324_v15  ;;  %v323_v19 = vld [vmem:[#allocation3 + $0x1f0] sm:$0xff]  ;;  %v286_v21 = vld [vmem:[#allocation3 + $0xc8] sm:$0xff]  ;;  %v305_v23 = vld [vmem:[#allocation3 + $0x160] sm:$0xff] }
  0x2d   : > { %360 = vmatpush.msra.mxu0 %v273_v9  ;;  %398 = vmatpush.msra.mxu2 %v307_v14  ;;  %v322_v22 = vld [vmem:[#allocation3 + $0x1e8] sm:$0xff]  ;;  %v321_v24 = vld [vmem:[#allocation3 + $0x1e0] sm:$0xff]  ;;  %v304_v27 = vld [vmem:[#allocation3 + $0x158] sm:$0xff] }
  0x2e   : > { %380 = vmatpush.msra.mxu1 %v289_v10  ;;  %418 = vmatpush.msra.mxu3 %v323_v19  ;;  %v269_v25 = vld [vmem:[#allocation3 + $0x40] sm:$0xff]  ;;  %v320_v28 = vld [vmem:[#allocation3 + $0x1d8] sm:$0xff]  ;;  %v303_v31 = vld [vmem:[#allocation3 + $0x150] sm:$0xff]  ;;  %v256_v10 = vand.u32 127, %v255_v63 }
  0x2f   : > { %361 = vmatpush.msra.mxu0 %v272_v11  ;;  %v285_v26 = vld [vmem:[#allocation3 + $0xc0] sm:$0xff]  ;;  %399 = vmatpush.msra.mxu2 %v306_v18  ;;  %v268_v29 = vld [vmem:[#allocation3 + $0x38] sm:$0xff]  ;;  %v319_v32 = vld [vmem:[#allocation3 + $0x1d0] sm:$0xff] }
  0x30   : > { %381 = vmatpush.msra.mxu1 %v288_v12  ;;  %419 = vmatpush.msra.mxu3 %v322_v22  ;;  %v284_v30 = vld [vmem:[#allocation3 + $0xb8] sm:$0xff]  ;;  %v267_v33 = vld [vmem:[#allocation3 + $0x30] sm:$0xff]  ;;  %v302_v35 = vld [vmem:[#allocation3 + $0x148] sm:$0xff]  ;;  %vm257_vm0 = vcmp.eq.s32.totalorder %v256_v10, 70 }
  0x31   : > { %362 = vmatpush.msra.mxu0 %v271_v16  ;;  %400 = vmatpush.msra.mxu2 %v305_v23  ;;  %v283_v34 = vld [vmem:[#allocation3 + $0xb0] sm:$0xff]  ;;  %v318_v36 = vld [vmem:[#allocation3 + $0x1c8] sm:$0xff]  ;;  %v301_v39 = vld [vmem:[#allocation3 + $0x140] sm:$0xff] }
  0x32   : > { %382 = vmatpush.msra.mxu1 %v287_v17  ;;  %420 = vmatpush.msra.mxu3 %v321_v24  ;;  %v266_v37 = vld [vmem:[#allocation3 + $0x28] sm:$0xff]  ;;  %v317_v40 = vld [vmem:[#allocation3 + $0x1c0] sm:$0xff]  ;;  %v300_v43 = vld [vmem:[#allocation3 + $0x138] sm:$0xff] }
  0x33   : > { %363 = vmatpush.msra.mxu0 %v270_v20  ;;  %401 = vmatpush.msra.mxu2 %v304_v27  ;;  %v282_v38 = vld [vmem:[#allocation3 + $0xa8] sm:$0xff]  ;;  %v265_v41 = vld [vmem:[#allocation3 + $0x20] sm:$0xff]  ;;  %v316_v44 = vld [vmem:[#allocation3 + $0x1b8] sm:$0xff] }
  0x34   : > { %383 = vmatpush.msra.mxu1 %v286_v21  ;;  %421 = vmatpush.msra.mxu3 %v320_v28  ;;  %v281_v42 = vld [vmem:[#allocation3 + $0xa0] sm:$0xff]  ;;  %v264_v45 = vld [vmem:[#allocation3 + $0x18] sm:$0xff]  ;;  %v299_v47 = vld [vmem:[#allocation3 + $0x130] sm:$0xff] }
  0x35   : > { %364 = vmatpush.msra.mxu0 %v269_v25  ;;  %402 = vmatpush.msra.mxu2 %v303_v31  ;;  %v280_v46 = vld [vmem:[#allocation3 + $0x98] sm:$0xff]  ;;  %v315_v48 = vld [vmem:[#allocation3 + $0x1b0] sm:$0xff]  ;;  %v298_v51 = vld [vmem:[#allocation3 + $0x128] sm:$0xff] }
  0x36   : > { %384 = vmatpush.msra.mxu1 %v285_v26  ;;  %422 = vmatpush.msra.mxu3 %v319_v32  ;;  %v263_v49 = vld [vmem:[#allocation3 + $0x10] sm:$0xff]  ;;  %v314_v52 = vld [vmem:[#allocation3 + $0x1a8] sm:$0xff]  ;;  %v297_v55 = vld [vmem:[#allocation3 + $0x120] sm:$0xff] }
  0x37   : > { %365 = vmatpush.msra.mxu0 %v268_v29  ;;  %403 = vmatpush.msra.mxu2 %v302_v35  ;;  %v279_v50 = vld [vmem:[#allocation3 + $0x90] sm:$0xff]  ;;  %v262_v53 = vld [vmem:[#allocation3 + $0x8] sm:$0xff]  ;;  %v313_v56 = vld [vmem:[#allocation3 + $0x1a0] sm:$0xff] }
  0x38   : > { %385 = vmatpush.msra.mxu1 %v284_v30  ;;  %423 = vmatpush.msra.mxu3 %v318_v36  ;;  %v278_v54 = vld [vmem:[#allocation3 + $0x88] sm:$0xff]  ;;  %v261_v57 = vld [vmem:[#allocation3] sm:$0xff]  ;;  %v340_v58 = vld [vmem:[#allocation3 + $0x278] sm:$0xff] }
  0x39   : > { %366 = vmatpush.msra.mxu0 %v267_v33  ;;  %404 = vmatpush.msra.mxu2 %v301_v39  ;;  %v277_v59 = vld [vmem:[#allocation3 + $0x80] sm:$0xff]  ;;  %v356_v60 = vld [vmem:[#allocation3 + $0x2f8] sm:$0xff]  ;;  %v246_v61 = vld [vmem:[%s861_s22] sm:$0xff] }
  0x3a   : > { %386 = vmatpush.msra.mxu1 %v283_v34  ;;  %424 = vmatpush.msra.mxu3 %v317_v40  ;;  %v873_v62 = vld [vmem:[%s861_s22 + $0x8] sm:$0xff]  ;;  %v876_v6 = vld [vmem:[%s861_s22 + $0x10] sm:$0xff]  ;;  %v338_v8 = vld [vmem:[#allocation3 + $0x268] sm:$0xff] }
  0x3b   : > { %367 = vmatpush.msra.mxu0 %v266_v37  ;;  %405 = vmatpush.msra.mxu2 %v300_v43  ;;  %v296_v0 = vld [vmem:[#allocation3 + $0x118] sm:$0xff]  ;;  %v339_v2 = vld [vmem:[#allocation3 + $0x270] sm:$0xff]  ;;  %v251_v7 = vsub.f32 %v873_v62, %v246_v61  ;;  %v354_v9 = vld [vmem:[#allocation3 + $0x2e8] sm:$0xff]  ;;  %v253_v15 = vsub.f32 %v876_v6, %v246_v61  ;;  %v259_v21 = vmul.f32 %v873_v62, %v246_v61 }
  0x3c   : > { %387 = vmatpush.msra.mxu1 %v282_v38  ;;  %425 = vmatpush.msra.mxu3 %v316_v44  ;;  %v312_v1 = vld [vmem:[#allocation3 + $0x198] sm:$0xff]  ;;  %v355_v3 = vld [vmem:[#allocation3 + $0x2f0] sm:$0xff]  ;;  %v294_v11 = vld [vmem:[#allocation3 + $0x108] sm:$0xff]  ;;  %v260_v22 = vmul.f32 %v876_v6, %v246_v61 }
  0x3d   : > { %368 = vmatpush.msra.mxu0 %v265_v41  ;;  %406 = vmatpush.msra.mxu2 %v299_v47  ;;  %v295_v4 = vld [vmem:[#allocation3 + $0x110] sm:$0xff]  ;;  %v310_v12 = vld [vmem:[#allocation3 + $0x188] sm:$0xff]  ;;  %v337_v13 = vld [vmem:[#allocation3 + $0x260] sm:$0xff]  ;;  %v252_v18 = vand.u32 2147483647, %v251_v7 }
  0x3e   : > { %388 = vmatpush.msra.mxu1 %v281_v42  ;;  %426 = vmatpush.msra.mxu3 %v315_v48  ;;  %v311_v5 = vld [vmem:[#allocation3 + $0x190] sm:$0xff]  ;;  %v353_v14 = vld [vmem:[#allocation3 + $0x2e0] sm:$0xff]  ;;  %v336_v19 = vld [vmem:[#allocation3 + $0x258] sm:$0xff]  ;;  %v254_v25 = vand.u32 2147483647, %v253_v15 }
  0x3f   : > { %369 = vmatpush.msra.mxu0 %v264_v45  ;;  %407 = vmatpush.msra.mxu2 %v298_v51  ;;  %v293_v16 = vld [vmem:[#allocation3 + $0x100] sm:$0xff]  ;;  %v352_v20 = vld [vmem:[#allocation3 + $0x2d8] sm:$0xff]  ;;  %v335_v23 = vld [vmem:[#allocation3 + $0x250] sm:$0xff]  ;;  %v258_v26 = vsel %vm257_vm0, 1.0, %v252_v18 }
  0x40   : > { %389 = vmatpush.msra.mxu1 %v280_v46  ;;  %427 = vmatpush.msra.mxu3 %v314_v52  ;;  %v309_v17 = vld [vmem:[#allocation3 + $0x180] sm:$0xff]  ;;  %v351_v24 = vld [vmem:[#allocation3 + $0x2d0] sm:$0xff]  ;;  %v334_v27 = vld [vmem:[#allocation3 + $0x248] sm:$0xff] }
  0x41   : > { %370 = vmatpush.msra.mxu0 %v263_v49  ;;  %408 = vmatpush.msra.mxu2 %v297_v55  ;;  %v350_v28 = vld [vmem:[#allocation3 + $0x2c8] sm:$0xff]  ;;  %v333_v29 = vld [vmem:[#allocation3 + $0x240] sm:$0xff]  ;;  %v332_v31 = vld [vmem:[#allocation3 + $0x238] sm:$0xff] }
  0x42   : > { %390 = vmatpush.msra.mxu1 %v279_v50  ;;  %428 = vmatpush.msra.mxu3 %v313_v56  ;;  %v349_v30 = vld [vmem:[#allocation3 + $0x2c0] sm:$0xff]  ;;  %v348_v32 = vld [vmem:[#allocation3 + $0x2b8] sm:$0xff]  ;;  %v331_v33 = vld [vmem:[#allocation3 + $0x230] sm:$0xff] }
  0x43   : > { %371 = vmatpush.msra.mxu0 %v262_v53  ;;  %409 = vmatpush.msra.mxu2 %v296_v0  ;;  %v347_v34 = vld [vmem:[#allocation3 + $0x2b0] sm:$0xff]  ;;  %v330_v35 = vld [vmem:[#allocation3 + $0x228] sm:$0xff]  ;;  %v329_v37 = vld [vmem:[#allocation3 + $0x220] sm:$0xff] }
  0x44   : > { %391 = vmatpush.msra.mxu1 %v278_v54  ;;  %429 = vmatpush.msra.mxu3 %v312_v1  ;;  %v346_v36 = vld [vmem:[#allocation3 + $0x2a8] sm:$0xff]  ;;  %v345_v38 = vld [vmem:[#allocation3 + $0x2a0] sm:$0xff]  ;;  %v328_v39 = vld [vmem:[#allocation3 + $0x218] sm:$0xff] }
  0x45   : > { %372 = vmatpush.msra.mxu0 %v261_v57  ;;  %410 = vmatpush.msra.mxu2 %v295_v4  ;;  %v344_v40 = vld [vmem:[#allocation3 + $0x298] sm:$0xff]  ;;  %v327_v41 = vld [vmem:[#allocation3 + $0x210] sm:$0xff]  ;;  %v326_v43 = vld [vmem:[#allocation3 + $0x208] sm:$0xff] }
  0x46   : > { %392 = vmatpush.msra.mxu1 %v277_v59  ;;  %430 = vmatpush.msra.mxu3 %v311_v5  ;;  %v343_v42 = vld [vmem:[#allocation3 + $0x290] sm:$0xff]  ;;  %v342_v44 = vld [vmem:[#allocation3 + $0x288] sm:$0xff]  ;;  %v325_v45 = vld [vmem:[#allocation3 + $0x200] sm:$0xff] }
  0x47   : > { %437 = vmatpush.msrb.mxu0 %v340_v58  ;;  %411 = vmatpush.msra.mxu2 %v294_v11  ;;  %v341_v46 = vld [vmem:[#allocation3 + $0x280] sm:$0xff]  ;;  %v511_v47 = vld [vmem:[#allocation5 + $0x78] sm:$0xff]  ;;  %v510_v48 = vld [vmem:[#allocation5 + $0x70] sm:$0xff] }
  0x48   : > { %457 = vmatpush.msrb.mxu1 %v356_v60  ;;  %431 = vmatpush.msra.mxu3 %v310_v12  ;;  %v509_v49 = vld [vmem:[#allocation5 + $0x68] sm:$0xff]  ;;  %v508_v50 = vld [vmem:[#allocation5 + $0x60] sm:$0xff]  ;;  %v507_v51 = vld [vmem:[#allocation5 + $0x58] sm:$0xff] }
  0x49   : > { %438 = vmatpush.msrb.mxu0 %v339_v2  ;;  %412 = vmatpush.msra.mxu2 %v293_v16  ;;  %v506_v52 = vld [vmem:[#allocation5 + $0x50] sm:$0xff]  ;;  %v505_v53 = vld [vmem:[#allocation5 + $0x48] sm:$0xff]  ;;  %v504_v54 = vld [vmem:[#allocation5 + $0x40] sm:$0xff] }
  0x4a   : > { %458 = vmatpush.msrb.mxu1 %v355_v3  ;;  %432 = vmatpush.msra.mxu3 %v309_v17  ;;  %v503_v55 = vld [vmem:[#allocation5 + $0x38] sm:$0xff]  ;;  %v502_v56 = vld [vmem:[#allocation5 + $0x30] sm:$0xff]  ;;  %v501_v57 = vld [vmem:[#allocation5 + $0x28] sm:$0xff] }
  0x4b   : > { %439 = vmatpush.msrb.mxu0 %v338_v8  ;;  %413 = vmatmul.f32.vlgmr.msra.gmra.mxu2 %v259_v21  ;;  %v500_v60 = vld [vmem:[#allocation5 + $0x20] sm:$0xff]  ;;  %v498_v0 = vld [vmem:[#allocation5 + $0x10] sm:$0xff]  ;;  %v497_v2 = vld [vmem:[#allocation5 + $0x8] sm:$0xff] }
  0x4c   : > { %459 = vmatpush.msrb.mxu1 %v354_v9  ;;  %433 = vmatmul.f32.vlgmr.msra.gmra.mxu3 %v260_v22  ;;  %v496_v4 = vld [vmem:[#allocation5] sm:$0xff] }
  0x4d   : > { %440 = vmatpush.msrb.mxu0 %v337_v13  ;;  %393 = vmatmul.f32.vlgmr.msra.gmra.mxu1 %v254_v25 }
  0x4e   : > { %460 = vmatpush.msrb.mxu1 %v353_v14  ;;  %373 = vmatmul.f32.vlgmr.msra.gmra.mxu0 %v258_v26 }
  0x4f   : > { %441 = vmatpush.msrb.mxu0 %v336_v19  ;;  %512 = vmatpush.msrb.mxu2 %v511_v47 }
  0x50   : > { %461 = vmatpush.msrb.mxu1 %v352_v20 }
  0x51   : > { %442 = vmatpush.msrb.mxu0 %v335_v23  ;;  %513 = vmatpush.msrb.mxu2 %v510_v48 }
  0x52   : > { %462 = vmatpush.msrb.mxu1 %v351_v24 }
  0x53   : > { %443 = vmatpush.msrb.mxu0 %v334_v27  ;;  %514 = vmatpush.msrb.mxu2 %v509_v49 }
  0x54   : > { %463 = vmatpush.msrb.mxu1 %v350_v28 }
  0x55   : > { %444 = vmatpush.msrb.mxu0 %v333_v29  ;;  %515 = vmatpush.msrb.mxu2 %v508_v50 }
  0x56   : > { %464 = vmatpush.msrb.mxu1 %v349_v30 }
  0x57   : > { %445 = vmatpush.msrb.mxu0 %v332_v31  ;;  %516 = vmatpush.msrb.mxu2 %v507_v51 }
  0x58   : > { %465 = vmatpush.msrb.mxu1 %v348_v32 }
  0x59   : > { %446 = vmatpush.msrb.mxu0 %v331_v33  ;;  %517 = vmatpush.msrb.mxu2 %v506_v52 }
  0x5a   : > { %466 = vmatpush.msrb.mxu1 %v347_v34 }
  0x5b   : > { %447 = vmatpush.msrb.mxu0 %v330_v35  ;;  %518 = vmatpush.msrb.mxu2 %v505_v53 }
  0x5c   : > { %467 = vmatpush.msrb.mxu1 %v346_v36 }
  0x5d   : > { %448 = vmatpush.msrb.mxu0 %v329_v37  ;;  %519 = vmatpush.msrb.mxu2 %v504_v54 }
  0x5e   : > { %468 = vmatpush.msrb.mxu1 %v345_v38 }
  0x5f   : > { %449 = vmatpush.msrb.mxu0 %v328_v39  ;;  %520 = vmatpush.msrb.mxu2 %v503_v55 }
  0x60   : > { %469 = vmatpush.msrb.mxu1 %v344_v40 }
  0x61   : > { %450 = vmatpush.msrb.mxu0 %v327_v41  ;;  %521 = vmatpush.msrb.mxu2 %v502_v56 }
  0x62   : > { %470 = vmatpush.msrb.mxu1 %v343_v42 }
  0x63   : > { %451 = vmatpush.msrb.mxu0 %v326_v43  ;;  %522 = vmatpush.msrb.mxu2 %v501_v57 }
  0x64   : > { %471 = vmatpush.msrb.mxu1 %v342_v44 }
  0x65   : > { %452 = vmatpush.msrb.mxu0 %v325_v45  ;;  %523 = vmatpush.msrb.mxu2 %v500_v60 }
  0x66   : > { %472 = vmatpush.msrb.mxu1 %v341_v46  ;;  %453 = vmatmul.f32.vlgmr.msrb.gmra.mxu0 %v873_v62  ;;  %v499_v62 = vld [vmem:[#allocation5 + $0x18] sm:$0xff] }
  0x67   : > { %473 = vmatmul.f32.vlgmr.msrb.gmra.mxu1 %v876_v6  ;;  %524 = vmatpush.msrb.mxu2 %v499_v62 }
  0x69   : > { %525 = vmatpush.msrb.mxu2 %v498_v0 }
  0x6b   : > { %526 = vmatpush.msrb.mxu2 %v497_v2 }
  0x6d   : > { %527 = vmatpush.msrb.mxu2 %v496_v4 }
  0xca   : > { %v394_v59 = vpop.f32.mrf.mxu1 }
  0xcb   : > { %v374_v58 = vpop.f32.mrf.mxu0 }
  0xcc   : > { %v395_v61 = vadd.f32 %v394_v59, %v374_v58 }
  0xce   : > { %v414_v63 = vpop.f32.mrf.mxu2 }
  0xcf   : > { %v415_v1 = vadd.f32 %v414_v63, %v395_v61  ;;  %v434_v3 = vpop.f32.mrf.mxu3 }
  0xd1   : > { %v435_v5 = vadd.f32 %v434_v3, %v415_v1 }
  0xe3   : > { %v454_v6 = vpop.f32.mrf.mxu0 }
  0xe4   : > { %v474_v7 = vpop.f32.mrf.mxu1  ;;  %v455_v8 = vadd.f32 %v454_v6, %v435_v5 }
  0xe6   : > { %v475_v9 = vadd.f32 %v474_v7, %v455_v8 }
  0xe8   : > { %v627_v10 = vmul.f32 -1.442695, %v475_v9 }
  0xea   : > { %679 = vpow2.f32 %v627_v10 }
  0xf0   : > { %v680_v11 = vpop.eup %679 }
  0xf1   : > { %v480_v12 = vadd.f32 1.0, %v680_v11 }
  0xf3   : > { %681 = vrcp.f32 %v480_v12  ;;  %v492_v16 = vand.u32 2147483648, %v480_v12  ;;  %v490_v18 = vand.u32 2147483647, %v480_v12  ;;  %vm486_vm2 = vweird.f32 %v480_v12 }
  0xf5   : > { %v493_v20 = vor.u32 1.1754944e-38, %v492_v16  ;;  %vm491_vm4 = vcmp.eq.f32.partialorder %v490_v18, 8.507059e+37 }
  0xf9   : > { %v682_v13 = vpop.eup %681 }
  0xfa   : > { %v482_v14 = vmul.f32 %v682_v13, %v480_v12  ;;  %vm487_vm1 = vweird.f32 %v682_v13 }
  0xfb   : > { %vm488_vm3 = vmor %vm486_vm2, %vm487_vm1 }
  0xfc   : > { %v483_v15 = vsub.f32 1.0, %v482_v14 }
  0xfe   : > { %v484_v17 = vmul.f32 %v682_v13, %v483_v15 }
 0x100   : > { %v485_v19 = vadd.f32 %v682_v13, %v484_v17 }
 0x102   : > { %v489_v21 = vsel %vm488_vm3, %v682_v13, %v485_v19 }
 0x103   : > { %v494_v22 = vsel %vm491_vm4, %v493_v20, %v489_v21 }
 0x104   : > { %528 = vmatmul.f32.vlgmr.msrb.gmra.mxu2 %v494_v22 }
 0x187   : > { %v529_v23 = vpop.f32.mrf.mxu2 }
 0x188   : > { %532 = vst [vmem:[%s245_s24] sm:$0xff] %v529_v23 }
 0x189 PF: > { %p12_p12 = scmp.ge.s32.totalorder %s818_s16, 4   ;;  %s905_s12 = smov %s769_s13 }
 0x18a   : > { %s906_s13 = smov %s828_s19  ;;  %s907_s14 = smov %s818_s16 }
 0x18b   :  { %14 = sbr.rel (!%p12_p12) target bundleno = 3 (0x3), region = 116 }
 0x190   :  { %552 = vsyncpa [#allocation4], 1 }
 0x191   :  { %554 = vsyncpa [#allocation4 + $0x1], 1 }
 0x192   :  { %555 = vsyncpa [#allocation6], 1 }

</bundles_post_ra>
